<compile_context>
chip_gen: v7x
topology: tpu7x:2x2x1
jax: 0.10.0
libtpu: 0.0.40
codegen_flags: <defaults>
</compile_context>

<pallas_src>
import numpy as np
import jax
import jax.numpy as jnp
from jax.experimental import pallas as pl
from jax.experimental.pallas import tpu as pltpu


# ----------------------------------------------------------------------------
# Pallas kernel: one batch element per grid step, all channels fused
# ----------------------------------------------------------------------------
def _attn_kernel(x_ref, w_ref, b_ref, same_ref, keep_ref, out_ref, attn_ref):
    # x_ref: (C*S, L) slab for one batch element (all channels at once).
    x = x_ref[...].astype(jnp.float32)                       # x_dim.float()

    # Fused QKV projection: one (C*S, L) @ (L, 3L) matmul (y = x @ W^T + b).
    qkv = jnp.dot(x, w_ref[...], preferred_element_type=jnp.float32) + b_ref[...]
    L = x.shape[-1]
    q = qkv[:, :L]
    k = qkv[:, L:2 * L]
    v = qkv[:, 2 * L:]

    # Full (C*S, C*S) score matrix; cross-channel entries neutralized
    # pre-softmax so the row softmax equals the module's per-channel softmax.
    scores = jnp.dot(q, k.T, preferred_element_type=jnp.float32)
    scores = scores * (1.0 / float(L) ** 0.5)
    scores = jnp.where(same_ref[...] > 0.5, scores, -1e30)

    m = jnp.max(scores, axis=-1, keepdims=True)
    e = jnp.exp(scores - m)
    p = e / jnp.sum(e, axis=-1, keepdims=True)

    # masked_fill(mask, 0) AFTER softmax: keep == 1 where the module keeps the
    # weight, 0 where the overlap/diagonal mask zeroes it (and off-channel,
    # where p is already exactly 0).
    p = p * keep_ref[...]

    attn_ref[...] = p                                         # == output_matrix_attn[b]
    out_ref[...] = jnp.dot(p, v,
                           preferred_element_type=jnp.float32).astype(out_ref.dtype)


# ----------------------------------------------------------------------------
# Mask construction (faithful replica of create_mask used in forward)
# ----------------------------------------------------------------------------
def _create_mask(num_subsequences, m, n):
    mask = np.zeros((num_subsequences, num_subsequences), dtype=bool)
    for i in range(num_subsequences):
        for j in range(num_subsequences):
            start_i, end_i = i * n, i * n + m
            start_j, end_j = j * n, j * n + m
            overlap_start = max(start_i, start_j)
            overlap_end = min(end_i, end_j)
            overlap_length = max(0, overlap_end - overlap_start)
            length_i = end_i - start_i
            length_j = end_j - start_j
            overlap_ratio = overlap_length / min(length_i, length_j)
            if (overlap_ratio >= 0.5 and overlap_ratio < 1) or i == j:
                mask[i, j] = True
            elif overlap_ratio >= 1:
                np.fill_diagonal(mask, False)
    return mask


# ----------------------------------------------------------------------------
# Full MultiHeadSelfAttentiondis.forward
# ----------------------------------------------------------------------------
def multi_head_self_attention_dis_forward(x, w_qkv, b_qkv, n):
    B, C, S, L = x.shape
    d_model = L                      # qkv = Linear(d_model, 3*d_model) on last axis
    CS = C * S

    # Per-channel overlap mask (S, S) and its (C*S, C*S) expansions.
    mask_s = _create_mask(S, d_model, n)                       # True == masked
    eye_c = np.eye(C, dtype=np.float32)
    same_ch = np.kron(eye_c, np.ones((S, S), dtype=np.float32))      # 1 iff same channel
    keep = np.kron(eye_c, (~mask_s).astype(np.float32))              # 1 iff kept weight

    # nn.Linear(L, 3L): y = x @ W^T + b ; chunk(3) on y == chunk W rows.
    w_t = jnp.asarray(w_qkv).astype(jnp.float32).T                   # (L, 3L)
    b_row = jnp.asarray(b_qkv).astype(jnp.float32).reshape(1, 3 * L)
    same_ch = jnp.asarray(same_ch)
    keep = jnp.asarray(keep)

    x2 = x.reshape(B, CS, L)         # same (C-major) flattening as output.view(B,-1,L)

    full2 = lambda b: (0, 0)
    per_b = lambda b: (b, 0, 0)

    output, output_matrix_attn = pl.pallas_call(
        _attn_kernel,
        out_shape=(
            jax.ShapeDtypeStruct((B, CS, L), x.dtype),         # output.view(B, -1, L)
            jax.ShapeDtypeStruct((B, CS, CS), jnp.float32),    # output_matrix_attn
        ),
        grid=(B,),
        in_specs=[
            pl.BlockSpec((None, CS, L), per_b),                # x (one batch slab)
            pl.BlockSpec((L, 3 * L), full2),                   # fused qkv weight^T
            pl.BlockSpec((1, 3 * L), full2),                   # fused qkv bias
            pl.BlockSpec((CS, CS), full2),                     # same-channel mask
            pl.BlockSpec((CS, CS), full2),                     # keep mask (post-softmax)
        ],
        out_specs=[
            pl.BlockSpec((None, CS, L), per_b),
            pl.BlockSpec((None, CS, CS), per_b),
        ],
        compiler_params=pltpu.CompilerParams(
            dimension_semantics=("parallel",)),
    )(x2, w_t, b_row, same_ch, keep)

    # TODO(synk): the module's print() calls and the dead `a == 1`
    # matplotlib/seaborn plotting branch are host-side side effects with no
    # Pallas equivalent and are omitted; fc_out is defined but unused in forward.
    return output, output_matrix_attn


# ----------------------------------------------------------------------------
if __name__ == "__main__":
    B, C, S, L = 2, 4, 8, 16         # batch, num_dims, num_subsequences, seq_length(=d_model)
    n = 8                            # subsequence stride used by create_mask

    key = jax.random.PRNGKey(0)
    kx, kw, kb = jax.random.split(key, 3)
    x = jax.random.normal(kx, (B, C, S, L), dtype=jnp.float32)

    # deterministic init of the qkv Linear(L, 3L) (PyTorch-style uniform bound)
    bound = 1.0 / np.sqrt(L)
    w_qkv = jax.random.uniform(kw, (3 * L, L), jnp.float32, -bound, bound)
    b_qkv = jax.random.uniform(kb, (3 * L,), jnp.float32, -bound, bound)

    output, output_matrix_attn = multi_head_self_attention_dis_forward(
        x, w_qkv, b_qkv, n)

    jax.block_until_ready(output)
    jax.block_until_ready(output_matrix_attn)
    assert output.shape == (B, C * S, L)
    assert output_matrix_attn.shape == (B, C * S, C * S)
    print("KERNEL_OK")
</pallas_src>

<mosaic_0001>
module attributes {stable_mosaic.version = 11 : i64} {
  func.func @_attn_kernel(%arg0: i32, %arg1: memref<1x32x16xf32, #tpu.memory_space<vmem>>, %arg2: memref<16x48xf32, #tpu.memory_space<vmem>>, %arg3: memref<1x48xf32, #tpu.memory_space<vmem>>, %arg4: memref<32x32xf32, #tpu.memory_space<vmem>>, %arg5: memref<32x32xf32, #tpu.memory_space<vmem>>, %arg6: memref<1x32x16xf32, #tpu.memory_space<vmem>>, %arg7: memref<1x32x32xf32, #tpu.memory_space<vmem>>) attributes {dimension_semantics = [#tpu.dimension_semantics<parallel>], iteration_bounds = array<i64: 2>, scalar_prefetch = 0 : i64, scratch_operands = 0 : i64, tpu.core_type = #tpu.core_type<tc>, window_params = [{transform_indices = @transform_0, window_bounds = array<i64: 1, 32, 16>}, {pipeline_mode = #tpu.pipeline_mode<synchronous>, transform_indices = @transform_1, window_bounds = array<i64: 16, 48>}, {pipeline_mode = #tpu.pipeline_mode<synchronous>, transform_indices = @transform_2, window_bounds = array<i64: 1, 48>}, {pipeline_mode = #tpu.pipeline_mode<synchronous>, transform_indices = @transform_3, window_bounds = array<i64: 32, 32>}, {pipeline_mode = #tpu.pipeline_mode<synchronous>, transform_indices = @transform_4, window_bounds = array<i64: 32, 32>}, {transform_indices = @transform_5, window_bounds = array<i64: 1, 32, 16>}, {transform_indices = @transform_6, window_bounds = array<i64: 1, 32, 32>}]} {
    %c0 = arith.constant 0 : index
    %c0_0 = arith.constant 0 : index
    %c0_1 = arith.constant 0 : index
    %0 = vector.load %arg1[%c0, %c0_0, %c0_1] : memref<1x32x16xf32, #tpu.memory_space<vmem>>, vector<1x32x16xf32>
    %1 = vector.shape_cast %0 : vector<1x32x16xf32> to vector<32x16xf32>
    %c0_2 = arith.constant 0 : index
    %c0_3 = arith.constant 0 : index
    %2 = vector.load %arg2[%c0_2, %c0_3] : memref<16x48xf32, #tpu.memory_space<vmem>>, vector<16x48xf32>
    %cst = arith.constant dense<0.000000e+00> : vector<32x48xf32>
    %3 = tpu.matmul %1, %2, %cst {dimension_numbers = #tpu.dot_dimension_numbers<[1], [0], [0], [1], [0, 0, 1, 1], [], []>} : vector<32x16xf32>, vector<16x48xf32>, vector<32x48xf32> -> vector<32x48xf32>
    %c0_4 = arith.constant 0 : index
    %c0_5 = arith.constant 0 : index
    %4 = vector.load %arg3[%c0_4, %c0_5] : memref<1x48xf32, #tpu.memory_space<vmem>>, vector<1x48xf32>
    %5 = vector.broadcast %4 : vector<1x48xf32> to vector<32x48xf32>
    %6 = arith.addf %3, %5 : vector<32x48xf32>
    %7 = vector.extract_strided_slice %6 {offsets = [0, 0], sizes = [32, 16], strides = [1, 1]} : vector<32x48xf32> to vector<32x16xf32>
    %8 = vector.extract_strided_slice %6 {offsets = [0, 16], sizes = [32, 16], strides = [1, 1]} : vector<32x48xf32> to vector<32x16xf32>
    %9 = vector.extract_strided_slice %6 {offsets = [0, 32], sizes = [32, 16], strides = [1, 1]} : vector<32x48xf32> to vector<32x16xf32>
    %10 = tpu.transpose %8, [1, 0] : vector<32x16xf32> -> vector<16x32xf32>
    %cst_6 = arith.constant dense<0.000000e+00> : vector<32x32xf32>
    %11 = tpu.matmul %7, %10, %cst_6 {dimension_numbers = #tpu.dot_dimension_numbers<[1], [0], [0], [1], [0, 0, 1, 1], [], []>} : vector<32x16xf32>, vector<16x32xf32>, vector<32x32xf32> -> vector<32x32xf32>
    %cst_7 = arith.constant 2.500000e-01 : f32
    %12 = vector.broadcast %cst_7 : f32 to vector<32x32xf32>
    %13 = arith.mulf %11, %12 : vector<32x32xf32>
    %c0_8 = arith.constant 0 : index
    %c0_9 = arith.constant 0 : index
    %14 = vector.load %arg4[%c0_8, %c0_9] : memref<32x32xf32, #tpu.memory_space<vmem>>, vector<32x32xf32>
    %cst_10 = arith.constant 5.000000e-01 : f32
    %15 = vector.broadcast %cst_10 : f32 to vector<32x32xf32>
    %16 = arith.cmpf ogt, %14, %15 : vector<32x32xf32>
    %cst_11 = arith.constant -1.000000e+30 : f32
    %17 = vector.broadcast %cst_11 : f32 to vector<32x32xf32>
    %18 = arith.select %16, %13, %17 : vector<32x32xi1>, vector<32x32xf32>
    %cst_12 = arith.constant dense<0xFF800000> : vector<32xf32>
    %19 = vector.multi_reduction <maximumf>, %18, %cst_12 [1] : vector<32x32xf32> to vector<32xf32>
    %20 = vector.shape_cast %19 : vector<32xf32> to vector<32x1xf32>
    %21 = vector.broadcast %20 : vector<32x1xf32> to vector<32x32xf32>
    %22 = arith.subf %18, %21 : vector<32x32xf32>
    %23 = math.exp %22 : vector<32x32xf32>
    %cst_13 = arith.constant dense<0.000000e+00> : vector<32xf32>
    %24 = vector.multi_reduction <add>, %23, %cst_13 [1] : vector<32x32xf32> to vector<32xf32>
    %25 = vector.shape_cast %24 : vector<32xf32> to vector<32x1xf32>
    %26 = vector.broadcast %25 : vector<32x1xf32> to vector<32x32xf32>
    %27 = arith.divf %23, %26 : vector<32x32xf32>
    %c0_14 = arith.constant 0 : index
    %c0_15 = arith.constant 0 : index
    %28 = vector.load %arg5[%c0_14, %c0_15] : memref<32x32xf32, #tpu.memory_space<vmem>>, vector<32x32xf32>
    %29 = arith.mulf %27, %28 : vector<32x32xf32>
    %c0_16 = arith.constant 0 : index
    %c0_17 = arith.constant 0 : index
    %c0_18 = arith.constant 0 : index
    %30 = vector.load %arg7[%c0_16, %c0_17, %c0_18] : memref<1x32x32xf32, #tpu.memory_space<vmem>>, vector<1x32x32xf32>
    %31 = vector.shape_cast %30 : vector<1x32x32xf32> to vector<32x32xf32>
    %32 = vector.shape_cast %29 : vector<32x32xf32> to vector<1x32x32xf32>
    tpu.vector_store %arg7[%c0_16, %c0_17, %c0_18], %32 {strides = array<i32>} : memref<1x32x32xf32, #tpu.memory_space<vmem>>, vector<1x32x32xf32>,
    %cst_19 = arith.constant dense<0.000000e+00> : vector<32x16xf32>
    %33 = tpu.matmul %29, %9, %cst_19 {dimension_numbers = #tpu.dot_dimension_numbers<[1], [0], [0], [1], [0, 0, 1, 1], [], []>} : vector<32x32xf32>, vector<32x16xf32>, vector<32x16xf32> -> vector<32x16xf32>
    %c0_20 = arith.constant 0 : index
    %c0_21 = arith.constant 0 : index
    %c0_22 = arith.constant 0 : index
    %34 = vector.load %arg6[%c0_20, %c0_21, %c0_22] : memref<1x32x16xf32, #tpu.memory_space<vmem>>, vector<1x32x16xf32>
    %35 = vector.shape_cast %34 : vector<1x32x16xf32> to vector<32x16xf32>
    %36 = vector.shape_cast %33 : vector<32x16xf32> to vector<1x32x16xf32>
    tpu.vector_store %arg6[%c0_20, %c0_21, %c0_22], %36 {strides = array<i32>} : memref<1x32x16xf32, #tpu.memory_space<vmem>>, vector<1x32x16xf32>,
    return
  }
  func.func @transform_0(%arg0: i32) -> (i32, i32, i32) {
    %c0_i32 = arith.constant 0 : i32
    %c0_i32_0 = arith.constant 0 : i32
    %c0_i32_1 = arith.constant 0 : i32
    return %arg0, %c0_i32, %c0_i32_0 : i32, i32, i32
  }
  func.func @transform_1(%arg0: i32) -> (i32, i32) {
    %c0_i32 = arith.constant 0 : i32
    %c0_i32_0 = arith.constant 0 : i32
    %c0_i32_1 = arith.constant 0 : i32
    return %c0_i32, %c0_i32_0 : i32, i32
  }
  func.func @transform_2(%arg0: i32) -> (i32, i32) {
    %c0_i32 = arith.constant 0 : i32
    %c0_i32_0 = arith.constant 0 : i32
    %c0_i32_1 = arith.constant 0 : i32
    return %c0_i32, %c0_i32_0 : i32, i32
  }
  func.func @transform_3(%arg0: i32) -> (i32, i32) {
    %c0_i32 = arith.constant 0 : i32
    %c0_i32_0 = arith.constant 0 : i32
    %c0_i32_1 = arith.constant 0 : i32
    return %c0_i32, %c0_i32_0 : i32, i32
  }
  func.func @transform_4(%arg0: i32) -> (i32, i32) {
    %c0_i32 = arith.constant 0 : i32
    %c0_i32_0 = arith.constant 0 : i32
    %c0_i32_1 = arith.constant 0 : i32
    return %c0_i32, %c0_i32_0 : i32, i32
  }
  func.func @transform_5(%arg0: i32) -> (i32, i32, i32) {
    %c0_i32 = arith.constant 0 : i32
    %c0_i32_0 = arith.constant 0 : i32
    %c0_i32_1 = arith.constant 0 : i32
    return %arg0, %c0_i32, %c0_i32_0 : i32, i32, i32
  }
  func.func @transform_6(%arg0: i32) -> (i32, i32, i32) {
    %c0_i32 = arith.constant 0 : i32
    %c0_i32_0 = arith.constant 0 : i32
    %c0_i32_1 = arith.constant 0 : i32
    return %arg0, %c0_i32, %c0_i32_0 : i32, i32, i32
  }
}

</mosaic_0001>

<bundles_post_ra>
// kernel: tpu_custom_call.1
= control target key start
LH: loop header
LB: loop body
LE: loop exit
PB: predicated region body
PF: predicated region fallthrough
CT: control target
= control target key end

     0   :  { %12 = vsyncpa [#allocation3], 0  ;;  %s1274_s0 = inlined_call_operand.vmem [shape: f32[2,32,16], index: 0, kind: input, shape index: {}]   ;;  %s1275_s1 = inlined_call_operand.vmem [shape: f32[16,48], index: 1, kind: input, shape index: {}]   ;;  %s1276_s2 = inlined_call_operand.vmem [shape: f32[1,48], index: 2, kind: input, shape index: {}]   ;;  %s1277_s3 = inlined_call_operand.vmem [shape: f32[32,32], index: 3, kind: input, shape index: {}]   ;;  %s1278_s4 = inlined_call_operand.vmem [shape: f32[32,32], index: 4, kind: input, shape index: {}]   ;;  %s1279_s5 = inlined_call_operand.vmem [shape: f32[2,32,16], index: 5, kind: output, shape index: {0}]   ;;  %s1280_s6 = inlined_call_operand.hbm [shape: f32[2,32,32], index: 6, kind: output, shape index: {1}]  }
   0x1   :  { %14 = vsyncpa [#allocation3 + $0x1], 0  ;;  %s1083_s21 = smov 0   ;;  %s1085_s22 = smov 0  }
   0x2   :  { %s1087_s23 = smov 0   ;;  %s1089_s24 = smov 0  }
   0x3 LB: > { %s1104_s25 = sadd.s32 4294967295, %s1041_s24   ;;  %s782_s26 = sadd.s32 4294967294, %s1041_s24   ;;  %s1041_s24 = sphi %s1089_s24, %s1286_s24   ;;  %s1037_s23 = sphi %s1087_s23, %s1285_s23   ;;  %s1033_s22 = sphi %s1085_s22, %s1284_s22   ;;  %s1029_s21 = sphi %s1083_s21, %s1283_s21  }
   0x4   : > { %s1108_s27 = sadd.s32 1, %s1041_s24   ;;  %s163_s28 = sadd.s32 1, %s1037_s23 }
   0x5   : > { %s160_s29 = ssub.s32 %s1041_s24, %s1108_s27  ;;  %p173_p0 = scmp.ne.s32.totalorder %s1037_s23, %s1033_s22 }
   0x6   : > { %p161_p1 = scmp.eq.s32.totalorder %s160_s29, 0  ;;  %p174_p2 = scmp.eq.s32.totalorder %s1104_s25, 1 }
   0x7   : > { %p179_p3 = scmp.ne.s32.totalorder %s1033_s22, %s1029_s21  ;;  %p180_p4 = scmp.eq.s32.totalorder %s782_s26, 1 }
   0x8   : > { %s1119_s30 = scalar_select %p161_p1, %s1037_s23, %s163_s28  }
   0x9   : > { %p1121_p5 = por %p174_p2, %p173_p0  ;;  %p1125_p6 = por %p180_p4, %p179_p3 }
   0xa   : > { %p785_p7 = scmp.ge.s32.totalorder %s1041_s24, 1  ;;  %p218_p8 = scmp.lt.s32.totalorder %s1041_s24, 3 }
   0xc   : > { %p219_p9 = pnand %p785_p7, %p218_p8 }
   0xd   : > { %v267_v0 = vld [vmem:[%s1275_s1] sm:$0xff] (!%p219_p9)  ;;  %v268_v1 = vld [vmem:[%s1275_s1 + $0x8] sm:$0xff] (!%p219_p9)  ;;  %p253_p10 = scmp.lt.s32.totalorder (!%p219_p9), %s1104_s25, 1  ;;  %vm276_vm0 = vcmask (!%p219_p9), 130048   ;;  %s1043_s20 = smov (!%p219_p9), 112   ;;  %vm503_vm3 = vcmask (!%p219_p9), 261120  }
   0xe   : > { %222 = sbr.rel (%p219_p9) target bundleno = 1146 (0x47a), region = 40  ;;  %v876_v2 = vpack.c.bf16 (!%p219_p9), %v268_v1, %v267_v0  ;;  %v791_v7 = vld [vmem:[%s1276_s2] ss:$0 sm:$0xff] (!%p219_p9)  ;;  %vm881_vm1 = vmpackc.low (!%p219_p9), %vm276_vm0, %vm276_vm0  ;;  %v492_v28 = vld [vmem:[%s1277_s3 + $0x8] sm:$0xff] (!%p219_p9)  ;;  %s1044_s16 = smov (!%p219_p9), 96  }
   0xf   : > { %v491_v26 = vld [vmem:[%s1277_s3] sm:$0xff] (!%p219_p9)  ;;  %v493_v32 = vld [vmem:[%s1277_s3 + $0x10] sm:$0xff] (!%p219_p9)  ;;  %vm496_vm4 = vcmp.gt.f32.partialorder (!%p219_p9), %v492_v28, 0.5  ;;  %v494_v35 = vld [vmem:[%s1277_s3 + $0x18] sm:$0xff] (!%p219_p9)  ;;  %s815_s15 = sshll.u32 (!%p219_p9), %s1104_s25, 9 }
  0x10   : > { %877 = vmatprep.subr.bf16.mxu0 (!%p219_p9), %v876_v2  ;;  %vm495_vm2 = vcmp.gt.f32.partialorder (!%p219_p9), %v491_v26, 0.5  ;;  %vm497_vm5 = vcmp.gt.f32.partialorder (!%p219_p9), %v493_v32, 0.5  ;;  %vm498_vm6 = vcmp.gt.f32.partialorder (!%p219_p9), %v494_v35, 0.5 }
  0x11   : > { %879 = vmatpush3.bf16.msra.mxu0 (!%p219_p9), %v876_v2 }
  0x15   : > { %s1139_s13 = scalar_select %p253_p10, %s1104_s25, 1 }
  0x16   : > { %s1045_s25 = smov [#allocation2]  }
  0x17   : > { %s813_s14 = sshll.u32 %s1139_s13, 5 }
  0x18   : > { %s257_s17 = scalar_lea.vmem %s1274_s0, %s813_s14 }
  0x19   : > { %v263_v3 = vld [vmem:[%s257_s17] sm:$0xff]  ;;  %v264_v4 = vld [vmem:[%s257_s17 + $0x8] sm:$0xff]  ;;  %v265_v5 = vld [vmem:[%s257_s17 + $0x10] sm:$0xff] }
  0x1a   : > { %842 = vmatprep.mubr.msk.f32.mxu0 %vm276_vm0, %v263_v3  ;;  %v266_v6 = vld [vmem:[%s257_s17 + $0x18] sm:$0xff]  ;;  %s250_s17 = sand.u32 1, %s1033_s22  }
  0x1b   : > { %843 = vmatmul.mubr.msk.f32.vlgmr.msra.gmra.mrb[0].mxu0 %vm276_vm0, %v264_v4  ;;  %s786_s18 = sshll.u32 %s250_s17, 5  ;;  %s1224_s26 = scalar_lea.sflag [#allocation3], %s250_s17 }
  0x1c   : > { %845 = vmatprep.mubr.msk.f32.mxu0 %vm276_vm0, %v265_v5  ;;  %s1193_s29 = scalar_lea.vmem [#allocation2], %s786_s18 }
  0x1f   : > { %846 = vmatmul.mubr.msk.f32.gmra.mrb[2].mxu0 %vm276_vm0, %v266_v6  ;;  %v549_v6 = vld [vmem:[%s1278_s4 + $0x8] sm:$0xff] }
  0xee   : > { %v844_v8 = vpop.f32.mrb[0].mxu0 }
  0xef   : > { %v361_v9 = vadd.f32 %v844_v8, %v791_v7  ;;  %v355_v10 = vpop.f32.mrb[1].mxu0 }
  0xf0   : > { %v356_v11 = vadd.f32 %v791_v7, %v355_v10 }
  0xf2   : > { %856 = vmatprep.mubr.msk.f32.mxu1 %vm276_vm0, %v356_v11  ;;  %v1155_v12 = vpack.i.bf16 %v361_v9, %v356_v11  ;;  %v847_v13 = vpop.f32.mrb[2].mxu0 }
  0xf3   : > { %v371_v14 = vadd.f32 %v847_v13, %v791_v7  ;;  %v365_v15 = vpop.f32.mrb[3].mxu0 }
  0xf4   : > { %944 = vrot.lane.b32.xlu0 %v1155_v12, %s1043_s20  ;;  %v366_v16 = vadd.f32 %v791_v7, %v365_v15 }
  0xf6   : > { %v948_v17 = vpack.i.bf16 %v371_v14, %v366_v16 }
  0xf8   : > { %949 = vrot.lane.b32.xlu0 %v948_v17, %s1043_s20  ;;  %s1218_s20 = scalar_lea.hbm %s1280_s6, %s815_s15 }
 0x166   : > { %v945_v18 = vpop.permute.xlu0 %944 }
 0x167   : > { %v947_v19 = vunpack.i.h.bf16 %v945_v18  ;;  %v946_v20 = vunpack.i.l.bf16 %v945_v18 }
 0x169   : > { %v880_v21 = vpack.c.bf16 %v947_v19, %v946_v20 }
 0x16a   : > { %v950_v22 = vpop.permute.xlu0 %949 }
 0x16b   : > { %882 = vmatprep.subr.msk.bf16.mxu1 %vm881_vm1, %v880_v21  ;;  %v952_v23 = vunpack.i.h.bf16 %v950_v22  ;;  %v951_v24 = vunpack.i.l.bf16 %v950_v22  ;;  %v551_v22 = vld [vmem:[%s1278_s4 + $0x18] sm:$0xff] }
 0x16c   : > { %885 = vmatpush3.bf16.xpose.msk.msra.mxu1 %vm881_vm1, %v880_v21 }
 0x16d   : > { %v886_v25 = vpack.c.bf16 %v952_v23, %v951_v24 }
 0x16f   : > { %888 = vmatprep.subr.msk.bf16.mxu1 %vm881_vm1, %v886_v25 }
 0x174   : > { %891 = vmatpush3.bf16.xpose.msk.msra.mxu1 %vm881_vm1, %v886_v25 }
 0x17b   : > { %857 = vmatmul.mubr.msk.f32.vlgmr.msra.gmra.mrb[0].mxu1 %vm276_vm0, %v361_v9 }
 0x17c   : > { %859 = vmatprep.mubr.msk.f32.mxu1 %vm276_vm0, %v366_v16 }
 0x17f   : > { %860 = vmatmul.mubr.msk.f32.gmra.mrb[2].mxu1 %vm276_vm0, %v371_v14 }
 0x24e   : > { %v858_v27 = vpop.f32.mrb[0].mxu1 }
 0x24f   : > { %v468_v29 = vpop.f32.mrb[1].mxu1  ;;  %v488_v30 = vmul.f32 0.25, %v858_v27  ;;  %v550_v27 = vld [vmem:[%s1278_s4 + $0x10] sm:$0xff] }
 0x250   : > { %v487_v31 = vmul.f32 0.25, %v468_v29 }
 0x251   : > { %v500_v40 = vsel %vm496_vm4, %v488_v30, -1e+30 }
 0x252   : > { %v861_v33 = vpop.f32.mrb[2].mxu1  ;;  %v499_v34 = vsel %vm495_vm2, %v487_v31, -1e+30  ;;  %v507_v42 = vsel %vm503_vm3, %v500_v40, -inf }
 0x253   : > { %v478_v36 = vpop.f32.mrb[3].mxu1  ;;  %v504_v37 = vsel %vm503_vm3, %v499_v34, -inf  ;;  %v490_v38 = vmul.f32 0.25, %v861_v33 }
 0x254   : > { %v489_v39 = vmul.f32 0.25, %v478_v36  ;;  %505 = vmax.xlane.f32.xlu1 %v504_v37 }
 0x255   : > { %v502_v44 = vsel %vm498_vm6, %v490_v38, -1e+30 }
 0x256   : > { %v501_v41 = vsel %vm497_vm5, %v489_v39, -1e+30  ;;  %v513_v45 = vsel %vm503_vm3, %v502_v44, -inf }
 0x257   : > { %v510_v43 = vsel %vm503_vm3, %v501_v41, -inf }
 0x258   : > { %508 = vmax.xlane.f32.xlu1 %v507_v42  ;;  %511 = vmax.xlane.f32.xlu0 %v510_v43 }
 0x25c   : > { %514 = vmax.xlane.f32.xlu1 %v513_v45 }
 0x26e   : > { %959 = vrot.lane.b32.xlu0 %v948_v17, %s1044_s16 }
 0x2e1   : > { %v506_v46 = vpop.xlane.xlu1 %505 }
 0x2e2   : > { %v516_v47 = vsub.f32 %v499_v34, %v506_v46 }
 0x2e4   : > { %v520_v50 = vmul.f32 1.442695, %v516_v47 }
 0x2e5   : > { %v509_v48 = vpop.xlane.xlu1 %508  ;;  %v512_v52 = vpop.xlane.xlu0 %511 }
 0x2e6   : > { %v517_v49 = vsub.f32 %v500_v40, %v509_v48  ;;  %v518_v55 = vsub.f32 %v501_v41, %v512_v52 }
 0x2e8   : > { %v522_v51 = vmul.f32 1.442695, %v517_v49  ;;  %v524_v57 = vmul.f32 1.442695, %v518_v55 }
 0x2e9   : > { %v515_v53 = vpop.xlane.xlu1 %514  ;;  %v960_v9 = vpop.permute.xlu0 %959 }
 0x2ea   : > { %963 = vpow2.f32 %v522_v51  ;;  %v519_v54 = vsub.f32 %v502_v44, %v515_v53  ;;  %v962_v15 = vunpack.i.h.bf16 %v960_v9  ;;  %v961_v16 = vunpack.i.l.bf16 %v960_v9 }
 0x2eb   : > { %965 = vpow2.f32 %v520_v50 }
 0x2ec   : > { %v526_v56 = vmul.f32 1.442695, %v519_v54  ;;  %v896_v24 = vpack.c.bf16 %v962_v15, %v961_v16 }
 0x2ee   : > { %967 = vpow2.f32 %v526_v56 }
 0x2ef   : > { %969 = vpow2.f32 %v524_v57 }
 0x2f4   : > { %v964_v58 = vpop.eup %963 }
 0x2f5   : > { %v531_v59 = vsel %vm503_vm3, %v964_v58, 0.0  ;;  %v966_v60 = vpop.eup %965 }
 0x2f6   : > { %532 = vadd.xlane.f32.xlu1 %v531_v59  ;;  %v528_v61 = vsel %vm503_vm3, %v966_v60, 0.0 }
 0x2f8   : > { %v968_v62 = vpop.eup %967 }
 0x2f9   : > { %v537_v63 = vsel %vm503_vm3, %v968_v62, 0.0  ;;  %v970_v0 = vpop.eup %969 }
 0x2fa   : > { %529 = vadd.xlane.f32.xlu1 %v528_v61  ;;  %v534_v1 = vsel %vm503_vm3, %v970_v0, 0.0 }
 0x2fe   : > { %538 = vadd.xlane.f32.xlu1 %v537_v63 }
 0x302   : > { %535 = vadd.xlane.f32.xlu1 %v534_v1 }
 0x313   : > { %954 = vrot.lane.b32.xlu1 %v1155_v12, %s1044_s16  ;;  %v548_v12 = vld [vmem:[%s1278_s4] sm:$0xff]  ;;  %s695_s16 = sshll.u32 %s1193_s29, 4  ;;  %s1220_s16 = int_to_ptr.vmem [resolvable:$true] %s695_s16 }
 0x314   : > { %s979_s28 = scalar_lea.vmem %s1220_s16, 512 }
 0x315   : > { %p980_p11 = scmp.ne.s32.totalorder %s1220_s16, %s979_s28 }
 0x317   : > { %p981_p12 = pnand %p980_p11, %p1121_p5 }
 0x319   : > { %p982_p13 = pneg %p981_p12 }
 0x383   : > { %v533_v2 = vpop.xlane.xlu1 %532 }
 0x384   : > { %971 = vrcp.f32 %v533_v2 }
 0x387   : > { %v530_v3 = vpop.xlane.xlu1 %529 }
 0x388   : > { %973 = vrcp.f32 %v530_v3 }
 0x38b   : > { %v539_v4 = vpop.xlane.xlu1 %538 }
 0x38c   : > { %975 = vrcp.f32 %v539_v4 }
 0x38e   : > { %v972_v5 = vpop.eup %971 }
 0x38f   : > { %v543_v7 = vmul.f32 %v972_v5, %v964_v58  ;;  %v536_v8 = vpop.xlane.xlu1 %535 }
 0x390   : > { %977 = vrcp.f32 %v536_v8 }
 0x391   : > { %v553_v10 = vmul.f32 %v549_v6, %v543_v7 }
 0x392   : > { %v974_v11 = vpop.eup %973 }
 0x393   : > { %557 = vst.msk [vmem:[%s1193_s29 + $0x8] sm:$0xff] %vm503_vm3, %v553_v10  ;;  %v955_v13 = vpop.permute.xlu1 %954  ;;  %v541_v14 = vmul.f32 %v974_v11, %v966_v60 }
 0x394   : > { %v957_v17 = vunpack.i.h.bf16 %v955_v13  ;;  %v956_v18 = vunpack.i.l.bf16 %v955_v13 }
 0x395   : > { %v552_v19 = vmul.f32 %v548_v12, %v541_v14 }
 0x396   : > { %v976_v20 = vpop.eup %975  ;;  %v892_v21 = vpack.c.bf16 %v957_v17, %v956_v18 }
 0x397   : > { %556 = vst.msk [vmem:[%s1193_s29] sm:$0xff] %vm503_vm3, %v552_v19  ;;  %870 = vmatprep.mubr.msk.f32.mxu0 %vm503_vm3, %v552_v19  ;;  %v547_v23 = vmul.f32 %v976_v20, %v968_v62 }
 0x398   : > { %893 = vmatprep.subr.bf16.mxu0 %v892_v21 }
 0x399   : > { %895 = vmatpush3.bf16.msra.mxu0 %v892_v21  ;;  %v555_v25 = vmul.f32 %v551_v22, %v547_v23 }
 0x39a   : > { %v978_v26 = vpop.eup %977  ;;  %897 = vmatprep.subr.bf16.mxu0 %v896_v24 }
 0x39b   : > { %v545_v28 = vmul.f32 %v978_v26, %v970_v0  ;;  %559 = vst.msk [vmem:[%s1193_s29 + $0x18] sm:$0xff] %vm503_vm3, %v555_v25 }
 0x39d   : > { %899 = vmatpush3.bf16.msra.mxu0 %v896_v24  ;;  %v554_v29 = vmul.f32 %v550_v27, %v545_v28 }
 0x39f   : > { %558 = vst.msk [vmem:[%s1193_s29 + $0x10] sm:$0xff] %vm503_vm3, %v554_v29  ;;  %s983_s29 = sshll.u32 %s1045_s25, 4  ;;  %s984_s29 = int_to_ptr.vmem [resolvable:$false] %s983_s29 }
 0x3a0   : > { %871 = vmatmul.mubr.msk.f32.vlgmr.msra.gmra.mrb[4].mxu0 %vm503_vm3, %v553_v10  ;;  %s985_s9 = scalar_lea.vmem %s984_s29, 1024  ;;  %p986_p0 = scmp.lt.s32.totalorder %s1220_s16, %s984_s29 }
 0x3a1   : > { %873 = vmatprep.mubr.msk.f32.mxu0 %vm503_vm3, %v554_v29  ;;  %p987_p1 = scmp.lt.s32.totalorder %s985_s9, %s979_s28 }
 0x3a3   : > { %p988_p2 = por %p987_p1, %p986_p0 }
 0x3a4   : > { %874 = vmatmul.mubr.msk.f32.gmra.mrb[6].mxu0 %vm503_vm3, %v555_v25 }
 0x3a5   : > { %p989_p3 = pnand %p988_p2, %p982_p13 }
 0x3a7   : > { %992 = shalt.err (!%p989_p3)
}
 0x3a8   : > { %s993_s17 = scalar_lea.hbm %s1218_s20, 512  ;;  %s997_s12 = scalar_lea.hbm %s1280_s6, 1024 }
 0x3a9   : > { %p994_p4 = scmp.ne.s32.totalorder %s1218_s20, %s993_s17  ;;  %p998_p9 = scmp.lt.u32.totalorder %s1218_s20, %s1280_s6 }
 0x3aa   : > { %p999_p10 = scmp.lt.u32.totalorder %s997_s12, %s993_s17  ;;  %p1001_p12 = scmp.lt.u32.totalorder %s993_s17, %s1218_s20 }
 0x3ab   : > { %p995_p7 = pnand %p994_p4, %p1121_p5 }
 0x3ac   : > { %p1000_p11 = por %p999_p10, %p998_p9 }
 0x3ad   : > { %p996_p8 = pneg %p995_p7 }
 0x3ae   : > { %p1002_p13 = por %p1001_p12, %p1000_p11 }
 0x3b0   : > { %p1003_p0 = pnand %p1002_p13, %p996_p8 }
 0x3b2   : > { %1006 = shalt.err (!%p1003_p0)
}
 0x3b3   : > { %s1046_s19 = smov 128   ;;  %s1047_s28 = smov 8  }
 0x3b4   : > { %900 = dma.vmem_to_hbm [thread:$0]  (%p1121_p5), %s1220_s16, 512, %s1218_s20, %s1224_s26, %s1046_s19, %s1046_s19, %s1047_s28  }
 0x3b5   : > { %s262_s9 = scalar_lea.vmem %s1279_s5, %s813_s14 }
 0x473   : > { %v872_v30 = vpop.f32.mrb[4].mxu0 }
 0x474   : > { %670 = vst.msk [vmem:[%s262_s9 + $0x8] sm:$0xff] %vm276_vm0, %v872_v30  ;;  %v650_v31 = vpop.f32.mrb[5].mxu0 }
 0x475   : > { %669 = vst.msk [vmem:[%s262_s9] sm:$0xff] %vm276_vm0, %v650_v31 }
 0x477   : > { %v875_v32 = vpop.f32.mrb[6].mxu0 }
 0x478   : > { %672 = vst.msk [vmem:[%s262_s9 + $0x18] sm:$0xff] %vm276_vm0, %v875_v32  ;;  %v660_v33 = vpop.f32.mrb[7].mxu0 }
 0x479   : > { %671 = vst.msk [vmem:[%s262_s9 + $0x10] sm:$0xff] %vm276_vm0, %v660_v33 }
 0x47a PF: > { %p906_p5 = scmp.ge.s32.totalorder %s1041_s24, 2  ;;  %s718_s7 = sand.u32 1, %s1029_s21  }
 0x47b   : > { %s719_s13 = scalar_lea.sflag [#allocation3], %s718_s7 }
 0x47c   : > { %p903_p1 = pnand %p906_p5, %p1125_p6 }
 0x47e   : > { %1024 = dma.done.wait (!%p903_p1), %s719_s13, 512  }
 0x47f   : > { %1026 = vsyncadd (!%p903_p1), %s719_s13, 4294966784  ;;  %p17_p2 = scmp.ge.s32.totalorder %s1108_s27, 4   ;;  %s1283_s21 = smov %s1033_s22 }
 0x480   : > { %s1284_s22 = smov %s1037_s23  ;;  %s1285_s23 = smov %s1119_s30 }
 0x481   : > { %s1286_s24 = smov %s1108_s27  ;;  %19 = sbr.rel (!%p17_p2) target bundleno = 3 (0x3), region = 87 }
 0x488   :  { %724 = vsyncpa [#allocation3], 1 }
 0x489   :  { %726 = vsyncpa [#allocation3 + $0x1], 1 }

</bundles_post_ra>
